<compile_context>
chip_gen: v7x
topology: tpu7x:2x2x1
jax: 0.10.0
libtpu: 0.0.40
codegen_flags: <defaults>
</compile_context>

<pallas_src>
import math
from functools import partial

import jax
import jax.numpy as jnp
from jax.experimental import pallas as pl
from jax.experimental.pallas import tpu as pltpu

_LANE = 128
_SUBLANE = 8


def _qnet_kernel(x_ref, w1_ref, b1_ref, w2_ref, b2_ref, o_ref):
    # hidden = relu(x @ W1 + b1); all arrays already lane-padded to 128.
    h = jnp.dot(x_ref[...], w1_ref[...], preferred_element_type=jnp.float32)
    h = jnp.maximum(h + b1_ref[...], 0.0)
    # q = hidden @ W2 + b2
    q = jnp.dot(h, w2_ref[...], preferred_element_type=jnp.float32)
    o_ref[...] = (q + b2_ref[...]).astype(o_ref.dtype)


def _round_up(n, m):
    return ((n + m - 1) // m) * m


def prepare_qnetwork_params(w1, b1, w2, b2):
    """Pad weights/biases to 128-lane widths ONCE (hoisted out of forward).

    Zero padding keeps the math exact: padded hidden units are relu(0+0)=0 and
    contribute nothing to fc2; padded output columns are sliced off.
    Returns (w1_p, b1_p, w2_p, b2_p, out_size).
    """
    in_size, hidden = w1.shape
    out_size = w2.shape[1]
    hid_p = _round_up(hidden, _LANE)
    out_p = _round_up(out_size, _LANE)

    w1_p = jnp.zeros((in_size, hid_p), jnp.float32).at[:, :hidden].set(w1)
    b1_p = jnp.zeros((1, hid_p), jnp.float32).at[:, :hidden].set(
        b1.astype(jnp.float32).reshape(1, -1))
    w2_p = jnp.zeros((hid_p, out_p), jnp.float32).at[:hidden, :out_size].set(w2)
    b2_p = jnp.zeros((1, out_p), jnp.float32).at[:, :out_size].set(
        b2.astype(jnp.float32).reshape(1, -1))
    return w1_p, b1_p, w2_p, b2_p, out_size


def _choose_tiling(batch, block_b):
    """Pick (tile_rows, padded_batch, grid_steps) with minimal row padding."""
    b8 = _round_up(max(batch, 1), _SUBLANE)
    tb_cap = max(_SUBLANE, _round_up(block_b, _SUBLANE))  # guard user block_b
    n = max(1, -(-b8 // tb_cap))
    # Ensure >=2 grid steps for reasonably sized batches so the "parallel"
    # batch axis can use both TensorCores on v7x (harmless elsewhere).
    if n == 1 and b8 >= 128:
        n = 2
    tb = _round_up(-(-b8 // n), _SUBLANE)
    return tb, n * tb, n


@partial(jax.jit, static_argnames=("out_size", "block_b"))
def _forward_impl(x, w1_p, b1_p, w2_p, b2_p, *, out_size, block_b):
    x = x.astype(jnp.float32)
    B, in_size = x.shape
    hid_p = w1_p.shape[1]
    out_p = w2_p.shape[1]

    tb, B_p, n_steps = _choose_tiling(B, block_b)
    x_p = x if B_p == B else jnp.pad(x, ((0, B_p - B), (0, 0)))

    out = pl.pallas_call(
        _qnet_kernel,
        out_shape=jax.ShapeDtypeStruct((B_p, out_p), jnp.float32),
        grid_spec=pltpu.PrefetchScalarGridSpec(
            num_scalar_prefetch=0,
            grid=(n_steps,),
            in_specs=[
                pl.BlockSpec((tb, in_size), lambda i: (i, 0)),       # x tile
                pl.BlockSpec((in_size, hid_p), lambda i: (0, 0)),    # W1 resident
                pl.BlockSpec((1, hid_p), lambda i: (0, 0)),          # b1 resident
                pl.BlockSpec((hid_p, out_p), lambda i: (0, 0)),      # W2 resident
                pl.BlockSpec((1, out_p), lambda i: (0, 0)),          # b2 resident
            ],
            out_specs=pl.BlockSpec((tb, out_p), lambda i: (i, 0)),
        ),
        compiler_params=pltpu.CompilerParams(
            # Batch axis is independent -> shard across TCs (2x on v7x).
            dimension_semantics=("parallel",),
            vmem_limit_bytes=32 * 1024 * 1024,
        ),
    )(x_p, w1_p, b1_p, w2_p, b2_p)

    # Slice stays inside the same jit as the kernel (no extra dispatch).
    return out[:B, :out_size]


def qnetwork_forward(x, padded_params, *, block_b=1024):
    """x: (B, In); padded_params from prepare_qnetwork_params."""
    w1_p, b1_p, w2_p, b2_p, out_size = padded_params
    return _forward_impl(x, w1_p, b1_p, w2_p, b2_p,
                         out_size=out_size, block_b=int(block_b))


def init_qnetwork_params(key, input_size, hidden_size, output_size):
    """Deterministic init mirroring nn.Linear's U(-1/sqrt(fan_in), 1/sqrt(fan_in))."""
    k1, k2, k3, k4 = jax.random.split(key, 4)
    bound1 = 1.0 / math.sqrt(input_size)
    bound2 = 1.0 / math.sqrt(hidden_size)
    # Stored already transposed: (in, out) layout for direct x @ W.
    w1 = jax.random.uniform(k1, (input_size, hidden_size), jnp.float32,
                            minval=-bound1, maxval=bound1)
    b1 = jax.random.uniform(k2, (hidden_size,), jnp.float32,
                            minval=-bound1, maxval=bound1)
    w2 = jax.random.uniform(k3, (hidden_size, output_size), jnp.float32,
                            minval=-bound2, maxval=bound2)
    b2 = jax.random.uniform(k4, (output_size,), jnp.float32,
                            minval=-bound2, maxval=bound2)
    return w1, b1, w2, b2


def _reference(x, w1, b1, w2, b2):
    return jnp.maximum(x @ w1 + b1, 0.0) @ w2 + b2


if __name__ == "__main__":
    # CartPole-style DQN: state dim 4, hidden 64, 2 actions.
    input_size, hidden_size, output_size = 4, 64, 2

    key = jax.random.PRNGKey(0)
    kx1, kx2, kp = jax.random.split(key, 3)
    w1, b1, w2, b2 = init_qnetwork_params(kp, input_size, hidden_size, output_size)

    # Pad/layout the weights ONCE (hoisted out of the per-call path).
    padded_params = prepare_qnetwork_params(w1, b1, w2, b2)

    # Replay-batch sized call: exercises batch tiling + >=2-step parallel grid
    # (second TensorCore on v7x) + minimal (8-row granularity) batch padding.
    x_big = jax.random.normal(kx1, (500, input_size), dtype=jnp.float32)
    q_big = jax.block_until_ready(qnetwork_forward(x_big, padded_params))
    ref_big = _reference(x_big, w1, b1, w2, b2)
    assert q_big.shape == (500, output_size)
    assert jnp.allclose(q_big, ref_big, atol=1e-5, rtol=1e-5)

    # Tiny batch (action selection): single 8-row tile, fast dispatch path.
    x_small = jax.random.normal(kx2, (3, input_size), dtype=jnp.float32)
    q_small = jax.block_until_ready(qnetwork_forward(x_small, padded_params))
    ref_small = _reference(x_small, w1, b1, w2, b2)
    assert q_small.shape == (3, output_size)
    assert jnp.allclose(q_small, ref_small, atol=1e-5, rtol=1e-5)

    print("KERNEL_OK")
</pallas_src>

<mosaic_0001>
module attributes {stable_mosaic.version = 11 : i64} {
  func.func @_qnet_kernel(%arg0: i32, %arg1: memref<256x4xf32, #tpu.memory_space<vmem>>, %arg2: memref<4x128xf32, #tpu.memory_space<vmem>>, %arg3: memref<1x128xf32, #tpu.memory_space<vmem>>, %arg4: memref<128x128xf32, #tpu.memory_space<vmem>>, %arg5: memref<1x128xf32, #tpu.memory_space<vmem>>, %arg6: memref<256x128xf32, #tpu.memory_space<vmem>>) attributes {dimension_semantics = [#tpu.dimension_semantics<parallel>], iteration_bounds = array<i64: 2>, scalar_prefetch = 0 : i64, scratch_operands = 0 : i64, tpu.core_type = #tpu.core_type<tc>, window_params = [{transform_indices = @transform_0, window_bounds = array<i64: 256, 4>}, {pipeline_mode = #tpu.pipeline_mode<synchronous>, transform_indices = @transform_1, window_bounds = array<i64: 4, 128>}, {pipeline_mode = #tpu.pipeline_mode<synchronous>, transform_indices = @transform_2, window_bounds = array<i64: 1, 128>}, {pipeline_mode = #tpu.pipeline_mode<synchronous>, transform_indices = @transform_3, window_bounds = array<i64: 128, 128>}, {pipeline_mode = #tpu.pipeline_mode<synchronous>, transform_indices = @transform_4, window_bounds = array<i64: 1, 128>}, {transform_indices = @transform_5, window_bounds = array<i64: 256, 128>}]} {
    %c0 = arith.constant 0 : index
    %c0_0 = arith.constant 0 : index
    %0 = vector.load %arg1[%c0, %c0_0] : memref<256x4xf32, #tpu.memory_space<vmem>>, vector<256x4xf32>
    %c0_1 = arith.constant 0 : index
    %c0_2 = arith.constant 0 : index
    %1 = vector.load %arg2[%c0_1, %c0_2] : memref<4x128xf32, #tpu.memory_space<vmem>>, vector<4x128xf32>
    %cst = arith.constant dense<0.000000e+00> : vector<256x128xf32>
    %2 = tpu.matmul %0, %1, %cst {dimension_numbers = #tpu.dot_dimension_numbers<[1], [0], [0], [1], [0, 0, 1, 1], [], []>} : vector<256x4xf32>, vector<4x128xf32>, vector<256x128xf32> -> vector<256x128xf32>
    %c0_3 = arith.constant 0 : index
    %c0_4 = arith.constant 0 : index
    %3 = vector.load %arg3[%c0_3, %c0_4] : memref<1x128xf32, #tpu.memory_space<vmem>>, vector<1x128xf32>
    %4 = vector.broadcast %3 : vector<1x128xf32> to vector<256x128xf32>
    %5 = arith.addf %2, %4 : vector<256x128xf32>
    %cst_5 = arith.constant 0.000000e+00 : f32
    %6 = vector.broadcast %cst_5 : f32 to vector<256x128xf32>
    %7 = arith.maximumf %5, %6 : vector<256x128xf32>
    %c0_6 = arith.constant 0 : index
    %c0_7 = arith.constant 0 : index
    %8 = vector.load %arg4[%c0_6, %c0_7] : memref<128x128xf32, #tpu.memory_space<vmem>>, vector<128x128xf32>
    %cst_8 = arith.constant dense<0.000000e+00> : vector<256x128xf32>
    %9 = tpu.matmul %7, %8, %cst_8 {dimension_numbers = #tpu.dot_dimension_numbers<[1], [0], [0], [1], [0, 0, 1, 1], [], []>} : vector<256x128xf32>, vector<128x128xf32>, vector<256x128xf32> -> vector<256x128xf32>
    %c0_9 = arith.constant 0 : index
    %c0_10 = arith.constant 0 : index
    %10 = vector.load %arg5[%c0_9, %c0_10] : memref<1x128xf32, #tpu.memory_space<vmem>>, vector<1x128xf32>
    %11 = vector.broadcast %10 : vector<1x128xf32> to vector<256x128xf32>
    %12 = arith.addf %9, %11 : vector<256x128xf32>
    %c0_11 = arith.constant 0 : index
    %c0_12 = arith.constant 0 : index
    %13 = vector.load %arg6[%c0_11, %c0_12] : memref<256x128xf32, #tpu.memory_space<vmem>>, vector<256x128xf32>
    tpu.vector_store %arg6[%c0_11, %c0_12], %12 {strides = array<i32>} : memref<256x128xf32, #tpu.memory_space<vmem>>, vector<256x128xf32>,
    return
  }
  func.func @transform_0(%arg0: i32) -> (i32, i32) {
    %c0_i32 = arith.constant 0 : i32
    %c0_i32_0 = arith.constant 0 : i32
    return %arg0, %c0_i32 : i32, i32
  }
  func.func @transform_1(%arg0: i32) -> (i32, i32) {
    %c0_i32 = arith.constant 0 : i32
    %c0_i32_0 = arith.constant 0 : i32
    %c0_i32_1 = arith.constant 0 : i32
    return %c0_i32, %c0_i32_0 : i32, i32
  }
  func.func @transform_2(%arg0: i32) -> (i32, i32) {
    %c0_i32 = arith.constant 0 : i32
    %c0_i32_0 = arith.constant 0 : i32
    %c0_i32_1 = arith.constant 0 : i32
    return %c0_i32, %c0_i32_0 : i32, i32
  }
  func.func @transform_3(%arg0: i32) -> (i32, i32) {
    %c0_i32 = arith.constant 0 : i32
    %c0_i32_0 = arith.constant 0 : i32
    %c0_i32_1 = arith.constant 0 : i32
    return %c0_i32, %c0_i32_0 : i32, i32
  }
  func.func @transform_4(%arg0: i32) -> (i32, i32) {
    %c0_i32 = arith.constant 0 : i32
    %c0_i32_0 = arith.constant 0 : i32
    %c0_i32_1 = arith.constant 0 : i32
    return %c0_i32, %c0_i32_0 : i32, i32
  }
  func.func @transform_5(%arg0: i32) -> (i32, i32) {
    %c0_i32 = arith.constant 0 : i32
    %c0_i32_0 = arith.constant 0 : i32
    return %arg0, %c0_i32 : i32, i32
  }
}

</mosaic_0001>

<bundles_post_ra>
// kernel: _forward_impl.1
= control target key start
LH: loop header
LB: loop body
LE: loop exit
PB: predicated region body
PF: predicated region fallthrough
CT: control target
= control target key end

     0   :  { %s1313_s18 = smov 0   ;;  %s1562_s0 = inlined_call_operand.vmem [shape: f32[512,4], index: 0, kind: input, shape index: {}]   ;;  %s1563_s1 = inlined_call_operand.vmem [shape: f32[4,128], index: 1, kind: input, shape index: {}]   ;;  %s1564_s2 = inlined_call_operand.vmem [shape: f32[1,128], index: 2, kind: input, shape index: {}]   ;;  %s1565_s3 = inlined_call_operand.vmem [shape: f32[128,128], index: 3, kind: input, shape index: {}]   ;;  %s1566_s4 = inlined_call_operand.vmem [shape: f32[1,128], index: 4, kind: input, shape index: {}]   ;;  %s1567_s5 = inlined_call_operand.vmem [shape: f32[512,128], index: 5, kind: output, shape index: {}]  }
   0x1 LB: > { %s962_s19 = sadd.s32 4294967295, %s1281_s18   ;;  %p966_p0 = scmp.ge.s32.totalorder %s1281_s18, 1  ;;  %s1281_s18 = sphi %s1313_s18, %s15_s18  }
   0x2   : > { %p188_p1 = scmp.lt.s32.totalorder %s1281_s18, 3 }
   0x4   : > { %p189_p2 = pnand %p966_p0, %p188_p1 }
   0x5   : > { %v260_v0 = vld [vmem:[%s1563_s1] sm:$0xf] (!%p189_p2)  ;;  %vm365_vm0 = vcmask (!%p189_p2), 1043456   ;;  %s967_s22 = sshll.u32 (!%p189_p2), %s962_s19, 5  ;;  %v627_v2 = vld [vmem:[%s1565_s3 + $0x8] sm:$0xff] (!%p189_p2)  ;;  %v628_v3 = vld [vmem:[%s1565_s3 + $0x10] sm:$0xff] (!%p189_p2) }
   0x6   : > { %192 = sbr.rel (%p189_p2) target bundleno = 512 (0x200), region = 40  ;;  %v626_v1 = vld [vmem:[%s1565_s3] sm:$0xff] (!%p189_p2)  ;;  %1089 = vmatprep.subr.msk.mxu0 (!%p189_p2), %vm365_vm0, %v260_v0  ;;  %p217_p3 = scmp.lt.s32.totalorder (!%p189_p2), %s967_s22, 63  ;;  %v629_v4 = vld [vmem:[%s1565_s3 + $0x18] sm:$0xff] (!%p189_p2)  ;;  %vm268_vm1 = vcmask (!%p189_p2), 31744   ;;  %v631_v8 = vld [vmem:[%s1565_s3 + $0x28] sm:$0xff] (!%p189_p2) }
   0x7   : > { %1090 = vmatpush3.msk.msra.mxu0 (!%p189_p2), %vm365_vm0, %v260_v0  ;;  %v1219_v5 = vpack.c.bf16 (!%p189_p2), %v627_v2, %v626_v1  ;;  %v1223_v6 = vpack.c.bf16 (!%p189_p2), %v629_v4, %v628_v3  ;;  %v630_v7 = vld [vmem:[%s1565_s3 + $0x20] sm:$0xff] (!%p189_p2)  ;;  %v632_v14 = vld [vmem:[%s1565_s3 + $0x30] sm:$0xff] (!%p189_p2)  ;;  %v633_v15 = vld [vmem:[%s1565_s3 + $0x38] sm:$0xff] (!%p189_p2) }
   0x8   : > { %v1227_v12 = vpack.c.bf16 (!%p189_p2), %v631_v8, %v630_v7  ;;  %v1231_v17 = vpack.c.bf16 (!%p189_p2), %v633_v15, %v632_v14  ;;  %v634_v19 = vld [vmem:[%s1565_s3 + $0x40] sm:$0xff] (!%p189_p2)  ;;  %v635_v20 = vld [vmem:[%s1565_s3 + $0x48] sm:$0xff] (!%p189_p2)  ;;  %v636_v24 = vld [vmem:[%s1565_s3 + $0x50] sm:$0xff] (!%p189_p2) }
   0x9   : > { %1220 = vmatprep.subr.bf16.mxu0 (!%p189_p2), %v1219_v5  ;;  %1251 = vmatprep.subr.bf16.mxu1 (!%p189_p2), %v1219_v5  ;;  %v1235_v22 = vpack.c.bf16 (!%p189_p2), %v635_v20, %v634_v19  ;;  %v637_v25 = vld [vmem:[%s1565_s3 + $0x58] sm:$0xff] (!%p189_p2)  ;;  %v638_v29 = vld [vmem:[%s1565_s3 + $0x60] sm:$0xff] (!%p189_p2)  ;;  %v639_v30 = vld [vmem:[%s1565_s3 + $0x68] sm:$0xff] (!%p189_p2) }
   0xa   : > { %1259 = vmatpush3.bf16.msra.mxu1 (!%p189_p2), %v1219_v5  ;;  %v1239_v27 = vpack.c.bf16 (!%p189_p2), %v637_v25, %v636_v24  ;;  %v1243_v32 = vpack.c.bf16 (!%p189_p2), %v639_v30, %v638_v29  ;;  %v640_v54 = vld [vmem:[%s1565_s3 + $0x70] sm:$0xff] (!%p189_p2)  ;;  %v641_v55 = vld [vmem:[%s1565_s3 + $0x78] sm:$0xff] (!%p189_p2)  ;;  %v1449_v57 = vld [vmem:[%s1564_s2] ss:$0 sm:$0xff] (!%p189_p2) }
   0xb   : > { %1252 = vmatprep.subr.bf16.mxu1 (!%p189_p2), %v1223_v6  ;;  %v1247_v56 = vpack.c.bf16 (!%p189_p2), %v641_v55, %v640_v54 }
   0xd   : > { %s1569_s22 = smov (!%p217_p3, %s967_s22), 63 }
   0xe   : > { %s968_s6 = sshll.u32 %s1569_s22, 3  ;;  %1260 = vmatpush3.bf16.msra.mxu1 %v1223_v6 }
   0xf   : > { %s1344_s9 = scalar_lea.vmem %s1562_s0, %s968_s6  ;;  %1253 = vmatprep.subr.bf16.mxu1 %v1227_v12  ;;  %s1493_s19 = scalar_lea.vmem %s1567_s5, %s968_s6 }
  0x10   : > { %v228_v9 = vld [vmem:[%s1344_s9] sm:$0xff]  ;;  %v229_v10 = vld [vmem:[%s1344_s9 + $0x8] sm:$0xff]  ;;  %v230_v11 = vld [vmem:[%s1344_s9 + $0x10] sm:$0xff] }
  0x11   : > { %1091 = vmatprep.mubr.msk.f32.mxu0 %vm268_vm1, %v228_v9  ;;  %v231_v13 = vld [vmem:[%s1344_s9 + $0x18] sm:$0xff]  ;;  %v232_v16 = vld [vmem:[%s1344_s9 + $0x20] sm:$0xff]  ;;  %v233_v18 = vld [vmem:[%s1344_s9 + $0x28] sm:$0xff] }
  0x12   : > { %1092 = vmatmul.mubr.msk.f32.vlgmr.msra.gmra.mrb[0].mxu0 %vm268_vm1, %v229_v10  ;;  %1261 = vmatpush3.bf16.msra.mxu1 %v1227_v12  ;;  %v234_v21 = vld [vmem:[%s1344_s9 + $0x30] sm:$0xff]  ;;  %v235_v23 = vld [vmem:[%s1344_s9 + $0x38] sm:$0xff]  ;;  %v236_v26 = vld [vmem:[%s1344_s9 + $0x40] sm:$0xff] }
  0x13   : > { %1094 = vmatprep.mubr.msk.f32.mxu0 %vm268_vm1, %v230_v11  ;;  %1222 = vmatpush3.bf16.msra.mxu0 %v1219_v5  ;;  %v237_v28 = vld [vmem:[%s1344_s9 + $0x48] sm:$0xff]  ;;  %v238_v31 = vld [vmem:[%s1344_s9 + $0x50] sm:$0xff]  ;;  %v239_v33 = vld [vmem:[%s1344_s9 + $0x58] sm:$0xff] }
  0x14   : > { %1224 = vmatprep.subr.bf16.mxu0 %v1223_v6  ;;  %1254 = vmatprep.subr.bf16.mxu1 %v1231_v17  ;;  %v240_v34 = vld [vmem:[%s1344_s9 + $0x60] sm:$0xff]  ;;  %v241_v35 = vld [vmem:[%s1344_s9 + $0x68] sm:$0xff]  ;;  %v242_v36 = vld [vmem:[%s1344_s9 + $0x70] sm:$0xff] }
  0x15   : > { %v243_v37 = vld [vmem:[%s1344_s9 + $0x78] sm:$0xff]  ;;  %v244_v38 = vld [vmem:[%s1344_s9 + $0x80] sm:$0xff]  ;;  %v245_v39 = vld [vmem:[%s1344_s9 + $0x88] sm:$0xff] }
  0x16   : > { %1095 = vmatmul.mubr.msk.f32.gmra.mrb[2].mxu0 %vm268_vm1, %v231_v13  ;;  %1262 = vmatpush3.bf16.msra.mxu1 %v1231_v17  ;;  %v246_v40 = vld [vmem:[%s1344_s9 + $0x90] sm:$0xff]  ;;  %v247_v41 = vld [vmem:[%s1344_s9 + $0x98] sm:$0xff]  ;;  %v248_v42 = vld [vmem:[%s1344_s9 + $0xa0] sm:$0xff] }
  0x17   : > { %1097 = vmatprep.mubr.msk.f32.mxu0 %vm268_vm1, %v232_v16  ;;  %1226 = vmatpush3.bf16.msra.mxu0 %v1223_v6  ;;  %v249_v43 = vld [vmem:[%s1344_s9 + $0xa8] sm:$0xff]  ;;  %v250_v44 = vld [vmem:[%s1344_s9 + $0xb0] sm:$0xff]  ;;  %v251_v45 = vld [vmem:[%s1344_s9 + $0xb8] sm:$0xff] }
  0x18   : > { %1228 = vmatprep.subr.bf16.mxu0 %v1227_v12  ;;  %1255 = vmatprep.subr.bf16.mxu1 %v1235_v22  ;;  %v252_v46 = vld [vmem:[%s1344_s9 + $0xc0] sm:$0xff]  ;;  %v253_v47 = vld [vmem:[%s1344_s9 + $0xc8] sm:$0xff]  ;;  %v254_v48 = vld [vmem:[%s1344_s9 + $0xd0] sm:$0xff] }
  0x19   : > { %v255_v49 = vld [vmem:[%s1344_s9 + $0xd8] sm:$0xff]  ;;  %v256_v50 = vld [vmem:[%s1344_s9 + $0xe0] sm:$0xff]  ;;  %v257_v51 = vld [vmem:[%s1344_s9 + $0xe8] sm:$0xff] }
  0x1a   : > { %1098 = vmatmul.mubr.msk.f32.gmra.mrb[4].mxu0 %vm268_vm1, %v233_v18  ;;  %1263 = vmatpush3.bf16.msra.mxu1 %v1235_v22  ;;  %v258_v52 = vld [vmem:[%s1344_s9 + $0xf0] sm:$0xff]  ;;  %v259_v53 = vld [vmem:[%s1344_s9 + $0xf8] sm:$0xff] }
  0x1b   : > { %1100 = vmatprep.mubr.msk.f32.mxu0 %vm268_vm1, %v234_v21  ;;  %1230 = vmatpush3.bf16.msra.mxu0 %v1227_v12 }
  0x1c   : > { %1232 = vmatprep.subr.bf16.mxu0 %v1231_v17  ;;  %1256 = vmatprep.subr.bf16.mxu1 %v1239_v27 }
  0x1e   : > { %1101 = vmatmul.mubr.msk.f32.gmra.mrb[6].mxu0 %vm268_vm1, %v235_v23  ;;  %1264 = vmatpush3.bf16.msra.mxu1 %v1239_v27 }
  0x1f   : > { %1103 = vmatprep.mubr.msk.f32.mxu0 %vm268_vm1, %v236_v26  ;;  %1234 = vmatpush3.bf16.msra.mxu0 %v1231_v17 }
  0x20   : > { %1236 = vmatprep.subr.bf16.mxu0 %v1235_v22  ;;  %1257 = vmatprep.subr.bf16.mxu1 %v1243_v32 }
  0x22   : > { %1104 = vmatmul.mubr.msk.f32.gmra.mrb[8].mxu0 %vm268_vm1, %v237_v28  ;;  %1265 = vmatpush3.bf16.msra.mxu1 %v1243_v32 }
  0x23   : > { %1106 = vmatprep.mubr.msk.f32.mxu0 %vm268_vm1, %v238_v31  ;;  %1238 = vmatpush3.bf16.msra.mxu0 %v1235_v22 }
  0x24   : > { %1240 = vmatprep.subr.bf16.mxu0 %v1239_v27  ;;  %1258 = vmatprep.subr.bf16.mxu1 %v1247_v56 }
  0x26   : > { %1107 = vmatmul.mubr.msk.f32.gmra.mrb[10].mxu0 %vm268_vm1, %v239_v33  ;;  %1266 = vmatpush3.bf16.msra.mxu1 %v1247_v56 }
  0x27   : > { %1109 = vmatprep.mubr.msk.f32.mxu0 %vm268_vm1, %v240_v34  ;;  %1242 = vmatpush3.bf16.msra.mxu0 %v1239_v27 }
  0x28   : > { %1244 = vmatprep.subr.bf16.mxu0 %v1243_v32 }
  0x2a   : > { %1110 = vmatmul.mubr.msk.f32.gmra.mrb[12].mxu0 %vm268_vm1, %v241_v35 }
  0x2b   : > { %1112 = vmatprep.mubr.msk.f32.mxu0 %vm268_vm1, %v242_v36  ;;  %1246 = vmatpush3.bf16.msra.mxu0 %v1243_v32 }
  0x2c   : > { %1248 = vmatprep.subr.bf16.mxu0 %v1247_v56 }
  0x2e   : > { %1113 = vmatmul.mubr.msk.f32.gmra.mrb[14].mxu0 %vm268_vm1, %v243_v37 }
  0x2f   : > { %1115 = vmatprep.mubr.msk.f32.mxu0 %vm268_vm1, %v244_v38  ;;  %1250 = vmatpush3.bf16.msra.mxu0 %v1247_v56 }
  0x32   : > { %1116 = vmatmul.mubr.msk.f32.gmra.mrb[16].mxu0 %vm268_vm1, %v245_v39 }
  0x33   : > { %1118 = vmatprep.mubr.msk.f32.mxu0 %vm268_vm1, %v246_v40 }
  0x36   : > { %1119 = vmatmul.mubr.msk.f32.gmra.mrb[18].mxu0 %vm268_vm1, %v247_v41 }
  0x37   : > { %1121 = vmatprep.mubr.msk.f32.mxu0 %vm268_vm1, %v248_v42 }
  0x3a   : > { %1122 = vmatmul.mubr.msk.f32.gmra.mrb[20].mxu0 %vm268_vm1, %v249_v43 }
  0x3b   : > { %1124 = vmatprep.mubr.msk.f32.mxu0 %vm268_vm1, %v250_v44 }
  0x3e   : > { %1125 = vmatmul.mubr.msk.f32.gmra.mrb[22].mxu0 %vm268_vm1, %v251_v45 }
  0x3f   : > { %1127 = vmatprep.mubr.msk.f32.mxu0 %vm268_vm1, %v252_v46 }
  0x42   : > { %1128 = vmatmul.mubr.msk.f32.gmra.mrb[24].mxu0 %vm268_vm1, %v253_v47 }
  0x43   : > { %1130 = vmatprep.mubr.msk.f32.mxu0 %vm268_vm1, %v254_v48 }
  0x46   : > { %1131 = vmatmul.mubr.msk.f32.gmra.mrb[26].mxu0 %vm268_vm1, %v255_v49 }
  0x47   : > { %1133 = vmatprep.mubr.msk.f32.mxu0 %vm268_vm1, %v256_v50 }
  0x4a   : > { %1134 = vmatmul.mubr.msk.f32.gmra.mrb[28].mxu0 %vm268_vm1, %v257_v51 }
  0x4b   : > { %1136 = vmatprep.mubr.msk.f32.mxu0 %vm268_vm1, %v258_v52 }
  0x4e   : > { %1137 = vmatmul.mubr.msk.f32.gmra.mrb[30].mxu0 %vm268_vm1, %v259_v53 }
  0xe5   : > { %v1093_v58 = vpop.f32.mrb[0].mxu0 }
  0xe6   : > { %v441_v59 = vadd.f32 %v1093_v58, %v1449_v57  ;;  %v435_v60 = vpop.f32.mrb[1].mxu0 }
  0xe7   : > { %v436_v61 = vadd.f32 %v1449_v57, %v435_v60 }
  0xe8   : > { %v595_v0 = vmax.f32 %v441_v59, 0.0 }
  0xe9   : > { %v594_v62 = vmax.f32 %v436_v61, 0.0  ;;  %v1096_v63 = vpop.f32.mrb[2].mxu0 }
  0xea   : > { %v451_v1 = vadd.f32 %v1096_v63, %v1449_v57  ;;  %v445_v2 = vpop.f32.mrb[3].mxu0 }
  0xeb   : > { %v446_v3 = vadd.f32 %v1449_v57, %v445_v2  ;;  %1171 = vmatprep.mubr.f32.mxu0 %v594_v62 }
  0xec   : > { %1172 = vmatmul.mubr.f32.vlgmr.msra.gmra.mrb[32].mxu0 %v595_v0  ;;  %v597_v6 = vmax.f32 %v451_v1, 0.0 }
  0xed   : > { %v596_v4 = vmax.f32 %v446_v3, 0.0  ;;  %v1099_v5 = vpop.f32.mrb[4].mxu0 }
  0xee   : > { %v461_v7 = vadd.f32 %v1099_v5, %v1449_v57  ;;  %v455_v8 = vpop.f32.mrb[5].mxu0 }
  0xef   : > { %v456_v9 = vadd.f32 %v1449_v57, %v455_v8  ;;  %1174 = vmatprep.mubr.f32.mxu0 %v596_v4 }
  0xf0   : > { %1175 = vmatmul.mubr.f32.gmra.mrb[34].mxu0 %v597_v6  ;;  %v599_v12 = vmax.f32 %v461_v7, 0.0 }
  0xf1   : > { %v598_v10 = vmax.f32 %v456_v9, 0.0  ;;  %v1102_v11 = vpop.f32.mrb[6].mxu0 }
  0xf2   : > { %v471_v13 = vadd.f32 %v1102_v11, %v1449_v57  ;;  %v465_v14 = vpop.f32.mrb[7].mxu0 }
  0xf3   : > { %1177 = vmatprep.mubr.f32.mxu0 %v598_v10  ;;  %v466_v15 = vadd.f32 %v1449_v57, %v465_v14 }
  0xf4   : > { %1178 = vmatmul.mubr.f32.gmra.mrb[36].mxu0 %v599_v12  ;;  %v601_v18 = vmax.f32 %v471_v13, 0.0 }
  0xf5   : > { %v1105_v16 = vpop.f32.mrb[8].mxu0  ;;  %v600_v17 = vmax.f32 %v466_v15, 0.0 }
  0xf6   : > { %v481_v19 = vadd.f32 %v1105_v16, %v1449_v57  ;;  %v475_v20 = vpop.f32.mrb[9].mxu0 }
  0xf7   : > { %v476_v21 = vadd.f32 %v1449_v57, %v475_v20  ;;  %1180 = vmatprep.mubr.f32.mxu1 %v600_v17 }
  0xf8   : > { %1181 = vmatmul.mubr.f32.vlgmr.msra.gmra.mrb[0].mxu1 %v601_v18  ;;  %v603_v24 = vmax.f32 %v481_v19, 0.0 }
  0xf9   : > { %v602_v22 = vmax.f32 %v476_v21, 0.0  ;;  %v1108_v23 = vpop.f32.mrb[10].mxu0 }
  0xfa   : > { %v491_v25 = vadd.f32 %v1108_v23, %v1449_v57  ;;  %v485_v26 = vpop.f32.mrb[11].mxu0 }
  0xfb   : > { %v486_v27 = vadd.f32 %v1449_v57, %v485_v26  ;;  %1183 = vmatprep.mubr.f32.mxu1 %v602_v22 }
  0xfc   : > { %1184 = vmatmul.mubr.f32.gmra.mrb[2].mxu1 %v603_v24  ;;  %v605_v30 = vmax.f32 %v491_v25, 0.0 }
  0xfd   : > { %v604_v28 = vmax.f32 %v486_v27, 0.0  ;;  %v1111_v29 = vpop.f32.mrb[12].mxu0  ;;  %v1486_v27 = vld [vmem:[%s1566_s4] ss:$0 sm:$0xff] }
  0xfe   : > { %v501_v31 = vadd.f32 %v1111_v29, %v1449_v57  ;;  %v495_v32 = vpop.f32.mrb[13].mxu0 }
  0xff   : > { %v496_v33 = vadd.f32 %v1449_v57, %v495_v32  ;;  %1186 = vmatprep.mubr.f32.mxu1 %v604_v28 }
 0x100   : > { %1187 = vmatmul.mubr.f32.gmra.mrb[4].mxu1 %v605_v30  ;;  %v607_v36 = vmax.f32 %v501_v31, 0.0 }
 0x101   : > { %v606_v34 = vmax.f32 %v496_v33, 0.0  ;;  %v1114_v35 = vpop.f32.mrb[14].mxu0 }
 0x102   : > { %v511_v37 = vadd.f32 %v1114_v35, %v1449_v57  ;;  %v505_v38 = vpop.f32.mrb[15].mxu0 }
 0x103   : > { %v506_v39 = vadd.f32 %v1449_v57, %v505_v38  ;;  %1189 = vmatprep.mubr.f32.mxu1 %v606_v34 }
 0x104   : > { %1190 = vmatmul.mubr.f32.gmra.mrb[6].mxu1 %v607_v36  ;;  %v609_v42 = vmax.f32 %v511_v37, 0.0 }
 0x105   : > { %v608_v40 = vmax.f32 %v506_v39, 0.0  ;;  %v1117_v41 = vpop.f32.mrb[16].mxu0 }
 0x106   : > { %v521_v43 = vadd.f32 %v1117_v41, %v1449_v57  ;;  %v515_v44 = vpop.f32.mrb[17].mxu0 }
 0x107   : > { %v516_v45 = vadd.f32 %v1449_v57, %v515_v44  ;;  %1192 = vmatprep.mubr.f32.mxu1 %v608_v40 }
 0x108   : > { %1193 = vmatmul.mubr.f32.gmra.mrb[8].mxu1 %v609_v42  ;;  %v611_v48 = vmax.f32 %v521_v43, 0.0 }
 0x109   : > { %v610_v46 = vmax.f32 %v516_v45, 0.0  ;;  %v1120_v47 = vpop.f32.mrb[18].mxu0 }
 0x10a   : > { %v531_v49 = vadd.f32 %v1120_v47, %v1449_v57  ;;  %v525_v50 = vpop.f32.mrb[19].mxu0 }
 0x10b   : > { %v526_v51 = vadd.f32 %v1449_v57, %v525_v50  ;;  %1195 = vmatprep.mubr.f32.mxu1 %v610_v46 }
 0x10c   : > { %1196 = vmatmul.mubr.f32.gmra.mrb[10].mxu1 %v611_v48  ;;  %v613_v54 = vmax.f32 %v531_v49, 0.0 }
 0x10d   : > { %v612_v52 = vmax.f32 %v526_v51, 0.0  ;;  %v1123_v53 = vpop.f32.mrb[20].mxu0 }
 0x10e   : > { %v541_v55 = vadd.f32 %v1123_v53, %v1449_v57  ;;  %v535_v56 = vpop.f32.mrb[21].mxu0 }
 0x10f   : > { %v536_v58 = vadd.f32 %v1449_v57, %v535_v56  ;;  %1198 = vmatprep.mubr.f32.mxu1 %v612_v52 }
 0x110   : > { %1199 = vmatmul.mubr.f32.gmra.mrb[12].mxu1 %v613_v54  ;;  %v615_v61 = vmax.f32 %v541_v55, 0.0 }
 0x111   : > { %v614_v59 = vmax.f32 %v536_v58, 0.0  ;;  %v1126_v60 = vpop.f32.mrb[22].mxu0 }
 0x112   : > { %v551_v62 = vadd.f32 %v1126_v60, %v1449_v57  ;;  %v545_v63 = vpop.f32.mrb[23].mxu0 }
 0x113   : > { %v546_v0 = vadd.f32 %v1449_v57, %v545_v63  ;;  %1201 = vmatprep.mubr.f32.mxu1 %v614_v59 }
 0x114   : > { %1202 = vmatmul.mubr.f32.gmra.mrb[14].mxu1 %v615_v61  ;;  %v617_v3 = vmax.f32 %v551_v62, 0.0 }
 0x115   : > { %v616_v1 = vmax.f32 %v546_v0, 0.0  ;;  %v1129_v2 = vpop.f32.mrb[24].mxu0 }
 0x116   : > { %v561_v4 = vadd.f32 %v1129_v2, %v1449_v57  ;;  %v555_v5 = vpop.f32.mrb[25].mxu0 }
 0x117   : > { %v556_v6 = vadd.f32 %v1449_v57, %v555_v5  ;;  %1204 = vmatprep.mubr.f32.mxu1 %v616_v1 }
 0x118   : > { %1205 = vmatmul.mubr.f32.gmra.mrb[16].mxu1 %v617_v3  ;;  %v619_v9 = vmax.f32 %v561_v4, 0.0 }
 0x119   : > { %v618_v7 = vmax.f32 %v556_v6, 0.0  ;;  %v1132_v8 = vpop.f32.mrb[26].mxu0 }
 0x11a   : > { %v571_v10 = vadd.f32 %v1132_v8, %v1449_v57  ;;  %v565_v11 = vpop.f32.mrb[27].mxu0 }
 0x11b   : > { %v566_v12 = vadd.f32 %v1449_v57, %v565_v11  ;;  %1207 = vmatprep.mubr.f32.mxu1 %v618_v7 }
 0x11c   : > { %1208 = vmatmul.mubr.f32.gmra.mrb[18].mxu1 %v619_v9  ;;  %v621_v15 = vmax.f32 %v571_v10, 0.0 }
 0x11d   : > { %v620_v13 = vmax.f32 %v566_v12, 0.0  ;;  %v1135_v14 = vpop.f32.mrb[28].mxu0 }
 0x11e   : > { %v581_v16 = vadd.f32 %v1135_v14, %v1449_v57  ;;  %v575_v17 = vpop.f32.mrb[29].mxu0 }
 0x11f   : > { %v576_v18 = vadd.f32 %v1449_v57, %v575_v17  ;;  %1210 = vmatprep.mubr.f32.mxu1 %v620_v13 }
 0x120   : > { %1211 = vmatmul.mubr.f32.gmra.mrb[20].mxu1 %v621_v15  ;;  %v623_v21 = vmax.f32 %v581_v16, 0.0 }
 0x121   : > { %v622_v19 = vmax.f32 %v576_v18, 0.0  ;;  %v1138_v20 = vpop.f32.mrb[30].mxu0 }
 0x122   : > { %v591_v22 = vadd.f32 %v1138_v20, %v1449_v57  ;;  %v585_v23 = vpop.f32.mrb[31].mxu0 }
 0x123   : > { %v586_v24 = vadd.f32 %v1449_v57, %v585_v23  ;;  %1213 = vmatprep.mubr.f32.mxu1 %v622_v19 }
 0x124   : > { %1214 = vmatmul.mubr.f32.gmra.mrb[22].mxu1 %v623_v21  ;;  %v625_v26 = vmax.f32 %v591_v22, 0.0 }
 0x125   : > { %v624_v25 = vmax.f32 %v586_v24, 0.0 }
 0x127   : > { %1216 = vmatprep.mubr.f32.mxu1 %v624_v25 }
 0x128   : > { %1217 = vmatmul.mubr.f32.gmra.mrb[24].mxu1 %v625_v26 }
 0x1bf   : > { %v1173_v57 = vpop.f32.mrb[32].mxu0 }
 0x1c0   : > { %v721_v28 = vadd.f32 %v1173_v57, %v1486_v27  ;;  %v715_v29 = vpop.f32.mrb[33].mxu0 }
 0x1c1   : > { %v716_v30 = vadd.f32 %v1486_v27, %v715_v29 }
 0x1c2   : > { %875 = vst [vmem:[%s1493_s19 + $0x8] sm:$0xff] %v721_v28 }
 0x1c3   : > { %874 = vst [vmem:[%s1493_s19] sm:$0xff] %v716_v30  ;;  %v1176_v31 = vpop.f32.mrb[34].mxu0 }
 0x1c4   : > { %v731_v32 = vadd.f32 %v1176_v31, %v1486_v27  ;;  %v725_v33 = vpop.f32.mrb[35].mxu0 }
 0x1c5   : > { %v726_v34 = vadd.f32 %v1486_v27, %v725_v33 }
 0x1c6   : > { %877 = vst [vmem:[%s1493_s19 + $0x18] sm:$0xff] %v731_v32 }
 0x1c7   : > { %876 = vst [vmem:[%s1493_s19 + $0x10] sm:$0xff] %v726_v34  ;;  %v1179_v35 = vpop.f32.mrb[36].mxu0 }
 0x1c8   : > { %v741_v36 = vadd.f32 %v1179_v35, %v1486_v27  ;;  %v735_v37 = vpop.f32.mrb[37].mxu0 }
 0x1c9   : > { %v736_v38 = vadd.f32 %v1486_v27, %v735_v37 }
 0x1ca   : > { %879 = vst [vmem:[%s1493_s19 + $0x28] sm:$0xff] %v741_v36 }
 0x1cb   : > { %878 = vst [vmem:[%s1493_s19 + $0x20] sm:$0xff] %v736_v38  ;;  %v1182_v39 = vpop.f32.mrb[0].mxu1 }
 0x1cc   : > { %v751_v40 = vadd.f32 %v1182_v39, %v1486_v27  ;;  %v745_v41 = vpop.f32.mrb[1].mxu1 }
 0x1cd   : > { %v746_v42 = vadd.f32 %v1486_v27, %v745_v41 }
 0x1ce   : > { %881 = vst [vmem:[%s1493_s19 + $0x38] sm:$0xff] %v751_v40 }
 0x1cf   : > { %880 = vst [vmem:[%s1493_s19 + $0x30] sm:$0xff] %v746_v42  ;;  %v1185_v43 = vpop.f32.mrb[2].mxu1 }
 0x1d0   : > { %v761_v44 = vadd.f32 %v1185_v43, %v1486_v27  ;;  %v755_v45 = vpop.f32.mrb[3].mxu1 }
 0x1d1   : > { %v756_v46 = vadd.f32 %v1486_v27, %v755_v45 }
 0x1d2   : > { %883 = vst [vmem:[%s1493_s19 + $0x48] sm:$0xff] %v761_v44 }
 0x1d3   : > { %882 = vst [vmem:[%s1493_s19 + $0x40] sm:$0xff] %v756_v46  ;;  %v1188_v47 = vpop.f32.mrb[4].mxu1 }
 0x1d4   : > { %v771_v48 = vadd.f32 %v1188_v47, %v1486_v27  ;;  %v765_v49 = vpop.f32.mrb[5].mxu1 }
 0x1d5   : > { %v766_v50 = vadd.f32 %v1486_v27, %v765_v49 }
 0x1d6   : > { %885 = vst [vmem:[%s1493_s19 + $0x58] sm:$0xff] %v771_v48 }
 0x1d7   : > { %884 = vst [vmem:[%s1493_s19 + $0x50] sm:$0xff] %v766_v50  ;;  %v1191_v51 = vpop.f32.mrb[6].mxu1 }
 0x1d8   : > { %v781_v52 = vadd.f32 %v1191_v51, %v1486_v27  ;;  %v775_v53 = vpop.f32.mrb[7].mxu1 }
 0x1d9   : > { %v776_v54 = vadd.f32 %v1486_v27, %v775_v53 }
 0x1da   : > { %887 = vst [vmem:[%s1493_s19 + $0x68] sm:$0xff] %v781_v52 }
 0x1db   : > { %886 = vst [vmem:[%s1493_s19 + $0x60] sm:$0xff] %v776_v54  ;;  %v1194_v55 = vpop.f32.mrb[8].mxu1 }
 0x1dc   : > { %v791_v56 = vadd.f32 %v1194_v55, %v1486_v27  ;;  %v785_v58 = vpop.f32.mrb[9].mxu1 }
 0x1dd   : > { %v786_v59 = vadd.f32 %v1486_v27, %v785_v58 }
 0x1de   : > { %889 = vst [vmem:[%s1493_s19 + $0x78] sm:$0xff] %v791_v56 }
 0x1df   : > { %888 = vst [vmem:[%s1493_s19 + $0x70] sm:$0xff] %v786_v59  ;;  %v1197_v60 = vpop.f32.mrb[10].mxu1 }
 0x1e0   : > { %v801_v61 = vadd.f32 %v1197_v60, %v1486_v27  ;;  %v795_v62 = vpop.f32.mrb[11].mxu1 }
 0x1e1   : > { %v796_v63 = vadd.f32 %v1486_v27, %v795_v62 }
 0x1e2   : > { %891 = vst [vmem:[%s1493_s19 + $0x88] sm:$0xff] %v801_v61 }
 0x1e3   : > { %890 = vst [vmem:[%s1493_s19 + $0x80] sm:$0xff] %v796_v63  ;;  %v1200_v0 = vpop.f32.mrb[12].mxu1 }
 0x1e4   : > { %v811_v1 = vadd.f32 %v1200_v0, %v1486_v27  ;;  %v805_v2 = vpop.f32.mrb[13].mxu1 }
 0x1e5   : > { %v806_v3 = vadd.f32 %v1486_v27, %v805_v2 }
 0x1e6   : > { %893 = vst [vmem:[%s1493_s19 + $0x98] sm:$0xff] %v811_v1 }
 0x1e7   : > { %892 = vst [vmem:[%s1493_s19 + $0x90] sm:$0xff] %v806_v3  ;;  %v1203_v4 = vpop.f32.mrb[14].mxu1 }
 0x1e8   : > { %v821_v5 = vadd.f32 %v1203_v4, %v1486_v27  ;;  %v815_v6 = vpop.f32.mrb[15].mxu1 }
 0x1e9   : > { %v816_v7 = vadd.f32 %v1486_v27, %v815_v6 }
 0x1ea   : > { %895 = vst [vmem:[%s1493_s19 + $0xa8] sm:$0xff] %v821_v5 }
 0x1eb   : > { %894 = vst [vmem:[%s1493_s19 + $0xa0] sm:$0xff] %v816_v7  ;;  %v1206_v8 = vpop.f32.mrb[16].mxu1 }
 0x1ec   : > { %v831_v9 = vadd.f32 %v1206_v8, %v1486_v27  ;;  %v825_v10 = vpop.f32.mrb[17].mxu1 }
 0x1ed   : > { %v826_v11 = vadd.f32 %v1486_v27, %v825_v10 }
 0x1ee   : > { %897 = vst [vmem:[%s1493_s19 + $0xb8] sm:$0xff] %v831_v9 }
 0x1ef   : > { %896 = vst [vmem:[%s1493_s19 + $0xb0] sm:$0xff] %v826_v11  ;;  %v1209_v12 = vpop.f32.mrb[18].mxu1 }
 0x1f0   : > { %v841_v13 = vadd.f32 %v1209_v12, %v1486_v27  ;;  %v835_v14 = vpop.f32.mrb[19].mxu1 }
 0x1f1   : > { %v836_v15 = vadd.f32 %v1486_v27, %v835_v14 }
 0x1f2   : > { %899 = vst [vmem:[%s1493_s19 + $0xc8] sm:$0xff] %v841_v13 }
 0x1f3   : > { %898 = vst [vmem:[%s1493_s19 + $0xc0] sm:$0xff] %v836_v15  ;;  %v1212_v16 = vpop.f32.mrb[20].mxu1 }
 0x1f4   : > { %v851_v17 = vadd.f32 %v1212_v16, %v1486_v27  ;;  %v845_v18 = vpop.f32.mrb[21].mxu1 }
 0x1f5   : > { %v846_v19 = vadd.f32 %v1486_v27, %v845_v18 }
 0x1f6   : > { %901 = vst [vmem:[%s1493_s19 + $0xd8] sm:$0xff] %v851_v17 }
 0x1f7   : > { %900 = vst [vmem:[%s1493_s19 + $0xd0] sm:$0xff] %v846_v19  ;;  %v1215_v20 = vpop.f32.mrb[22].mxu1 }
 0x1f8   : > { %v861_v21 = vadd.f32 %v1215_v20, %v1486_v27  ;;  %v855_v22 = vpop.f32.mrb[23].mxu1 }
 0x1f9   : > { %v856_v23 = vadd.f32 %v1486_v27, %v855_v22 }
 0x1fa   : > { %903 = vst [vmem:[%s1493_s19 + $0xe8] sm:$0xff] %v861_v21 }
 0x1fb   : > { %902 = vst [vmem:[%s1493_s19 + $0xe0] sm:$0xff] %v856_v23  ;;  %v1218_v24 = vpop.f32.mrb[24].mxu1 }
 0x1fc   : > { %v871_v25 = vadd.f32 %v1218_v24, %v1486_v27  ;;  %v865_v26 = vpop.f32.mrb[25].mxu1 }
 0x1fd   : > { %v866_v57 = vadd.f32 %v1486_v27, %v865_v26 }
 0x1fe   : > { %905 = vst [vmem:[%s1493_s19 + $0xf8] sm:$0xff] %v871_v25 }
 0x1ff   : > { %904 = vst [vmem:[%s1493_s19 + $0xf0] sm:$0xff] %v866_v57 }
 0x200 PF: > { %s15_s18 = sadd.s32 1, %s1281_s18  }
 0x201   : > { %p12_p4 = scmp.ge.s32.totalorder %s15_s18, 4  }
 0x203   :  { %14 = sbr.rel (!%p12_p4) target bundleno = 1 (0x1), region = 70 }

</bundles_post_ra>
